<compile_context>
chip_gen: v7x
topology: tpu7x:2x2x1
jax: 0.10.0
libtpu: 0.0.40
codegen_flags: <defaults>
</compile_context>

<pallas_src>
import jax
import jax.numpy as jnp
from jax import lax
from jax.experimental import pallas as pl
from jax.experimental.pallas import tpu as pltpu


def _cdiv(a, b):
    return -(-a // b)


def _round_up(x, m):
    return _cdiv(x, m) * m


def _nk_align(dim):
    # 256-aligned tiles keep the v6e/v7x 2x256^2 MXU passes full; fall back
    # to the minimum lane-dense 128 for tiny dims so padding stays small.
    return 256 if _round_up(dim, 128) >= 256 else 128


def _choose_tile(dim, max_tile, align):
    """Evenly split `dim` into cdiv(dim, max_tile) tiles rounded to `align`.

    Returns (tile, padded_dim).  Guarantees tile <= max_tile (max_tile must be
    a multiple of align) and padded_dim - dim < tile (i.e. < 1 tile of waste).
    """
    padded = _round_up(dim, align)
    n_tiles = _cdiv(padded, max_tile)
    tile = _round_up(_cdiv(padded, n_tiles), align)
    return tile, n_tiles * tile


def _linear_kernel(x_ref, w_ref, b_ref, o_ref):
    # Grid = (M//tm, N//tn, K//tk); K innermost ("arbitrary").  The output
    # block index is constant across k, so o_ref stays resident in VMEM and
    # doubles as the f32 accumulator (no scratch, no finalize copy).
    k = pl.program_id(2)

    @pl.when(k == 0)
    def _init():
        # Fold the bias into the accumulator init: one broadcast per output
        # tile, off the steady-state K loop.
        o_ref[...] = jnp.broadcast_to(b_ref[...], o_ref.shape)

    # x tile: (tm, tk), w tile: (tn, tk).  Contract on the weight's LAST dim
    # (PyTorch layout) -> no transposed copy of the weight anywhere.
    o_ref[...] += lax.dot_general(
        x_ref[...],
        w_ref[...],
        dimension_numbers=(((1,), (1,)), ((), ())),
        preferred_element_type=jnp.float32,
    )


def make_fully_connected(weight, bias, *, tm_max=512, tn_max=1024, tk_max=1024):
    """Build a forward fn for y = x @ weight.T + bias (torch.nn.Linear).

    weight: (output_dim, input_dim) float32 (PyTorch convention)
    bias:   (output_dim,)           float32

    Parameter padding / layout work is done ONCE here (params are static);
    the returned callable only pads x (cheap) per call.
    """
    weight = jnp.asarray(weight, jnp.float32)
    bias = jnp.asarray(bias, jnp.float32)
    out_dim, in_dim = weight.shape
    assert bias.shape == (out_dim,)

    tn, N = _choose_tile(out_dim, tn_max, _nk_align(out_dim))
    tk, K = _choose_tile(in_dim, tk_max, _nk_align(in_dim))

    # One-time padding of the static parameters (off the per-call hot path).
    if N != out_dim or K != in_dim:
        wp = jnp.pad(weight, ((0, N - out_dim), (0, K - in_dim)))
    else:
        wp = weight
    bp = (bias if N == out_dim else jnp.pad(bias, (0, N - out_dim))).reshape(1, N)

    def forward(x):
        x = jnp.asarray(x, jnp.float32)
        B, in_dim_x = x.shape
        assert in_dim_x == in_dim, "x inner dim must match weight inner dim"

        tm, M = _choose_tile(B, tm_max, 8)
        if M != B or K != in_dim:
            xp = jnp.pad(x, ((0, M - B), (0, K - in_dim)))
        else:
            xp = x

        grid = (M // tm, N // tn, K // tk)

        # Truthful HBM traffic estimate, including re-read factors under the
        # 3-D grid: x is read once per N tile, weight once per M tile.
        cost = pl.CostEstimate(
            flops=2 * M * N * K,
            transcendentals=0,
            bytes_accessed=4 * (M * K * (N // tn)
                                + N * K * (M // tm)
                                + N * (M // tm)
                                + M * N),
        )

        out = pl.pallas_call(
            _linear_kernel,
            out_shape=jax.ShapeDtypeStruct((M, N), jnp.float32),
            grid_spec=pltpu.PrefetchScalarGridSpec(
                num_scalar_prefetch=0,
                grid=grid,
                in_specs=[
                    pl.BlockSpec((tm, tk), lambda i, j, k: (i, k)),  # x tile
                    pl.BlockSpec((tn, tk), lambda i, j, k: (j, k)),  # weight tile
                    pl.BlockSpec((1, tn), lambda i, j, k: (0, j)),   # bias tile
                ],
                out_specs=pl.BlockSpec((tm, tn), lambda i, j, k: (i, j)),
            ),
            compiler_params=pltpu.CompilerParams(
                dimension_semantics=("parallel", "parallel", "arbitrary"),
                # ~16 MiB double-buffered footprint at max tiles; 48 MiB cap
                # is safe on every generation (v7x: 64 MiB physical per TC).
                vmem_limit_bytes=48 << 20,
            ),
            cost_estimate=cost,
        )(xp, wp, bp)

        if M != B or N != out_dim:
            out = out[:B, :out_dim]
        return out

    return forward


def fully_connected(x, weight, bias, **tile_kwargs):
    """Convenience one-shot wrapper (builds the padded params each call)."""
    return make_fully_connected(weight, bias, **tile_kwargs)(x)


if __name__ == "__main__":
    key = jax.random.PRNGKey(0)

    # --- Test 1: small shapes implied by the module (batch=8, in=32, out=16)
    B, INPUT_DIM, OUTPUT_DIM = 8, 32, 16
    kx, kw, kb, k2 = jax.random.split(key, 4)

    x = jax.random.normal(kx, (B, INPUT_DIM), dtype=jnp.float32)
    bound = 1.0 / (INPUT_DIM ** 0.5)  # mimic nn.Linear U(-1/sqrt(in), 1/sqrt(in))
    weight = jax.random.uniform(
        kw, (OUTPUT_DIM, INPUT_DIM), minval=-bound, maxval=bound, dtype=jnp.float32
    )
    bias = jax.random.uniform(
        kb, (OUTPUT_DIM,), minval=-bound, maxval=bound, dtype=jnp.float32
    )

    fc = make_fully_connected(weight, bias)   # one-time param padding/setup
    y = fc(x)
    jax.block_until_ready(y)
    y_ref = x @ weight.T + bias
    assert y.shape == (B, OUTPUT_DIM)
    assert jnp.allclose(y, y_ref, atol=1e-5, rtol=1e-5)

    # --- Test 2: medium, non-power-of-2 shape exercising even-split tiling,
    # K padding (640 -> 768, not 1024) and output slicing.
    B2, IN2, OUT2 = 384, 640, 768
    ka, kb2, kc = jax.random.split(k2, 3)
    x2 = jax.random.normal(ka, (B2, IN2), dtype=jnp.float32)
    w2 = jax.random.normal(kb2, (OUT2, IN2), dtype=jnp.float32) * 0.02
    b2 = jax.random.normal(kc, (OUT2,), dtype=jnp.float32) * 0.02

    fc2 = make_fully_connected(w2, b2)
    y2 = fc2(x2)
    jax.block_until_ready(y2)
    y2_ref = x2 @ w2.T + b2
    assert y2.shape == (B2, OUT2)
    assert jnp.allclose(y2, y2_ref, atol=1e-3, rtol=1e-3)

    print("KERNEL_OK")
</pallas_src>

<mosaic_0001>
module attributes {stable_mosaic.version = 11 : i64} {
  func.func @_linear_kernel(%arg0: i32, %arg1: i32, %arg2: i32, %arg3: memref<8x128xf32, #tpu.memory_space<vmem>>, %arg4: memref<128x128xf32, #tpu.memory_space<vmem>>, %arg5: memref<1x128xf32, #tpu.memory_space<vmem>>, %arg6: memref<8x128xf32, #tpu.memory_space<vmem>>) attributes {dimension_semantics = [#tpu.dimension_semantics<parallel>, #tpu.dimension_semantics<parallel>, #tpu.dimension_semantics<arbitrary>], iteration_bounds = array<i64: 1, 1, 1>, scalar_prefetch = 0 : i64, scratch_operands = 0 : i64, tpu.core_type = #tpu.core_type<tc>, window_params = [{transform_indices = @transform_0, window_bounds = array<i64: 8, 128>}, {transform_indices = @transform_1, window_bounds = array<i64: 128, 128>}, {transform_indices = @transform_2, window_bounds = array<i64: 1, 128>}, {transform_indices = @transform_3, window_bounds = array<i64: 8, 128>}]} {
    %c0_i32 = arith.constant 0 : i32
    %0 = arith.cmpi eq, %arg2, %c0_i32 : i32
    %1 = arith.extui %0 : i1 to i32
    %c0_i32_0 = arith.constant 0 : i32
    %2 = arith.cmpi ne, %1, %c0_i32_0 : i32
    scf.if %2 {
      %c0_8 = arith.constant 0 : index
      %c0_9 = arith.constant 0 : index
      %9 = vector.load %arg5[%c0_8, %c0_9] : memref<1x128xf32, #tpu.memory_space<vmem>>, vector<1x128xf32>
      %10 = vector.shape_cast %9 : vector<1x128xf32> to vector<1x128xf32>
      %11 = vector.broadcast %10 : vector<1x128xf32> to vector<8x128xf32>
      %c0_10 = arith.constant 0 : index
      %c0_11 = arith.constant 0 : index
      %12 = vector.load %arg6[%c0_10, %c0_11] : memref<8x128xf32, #tpu.memory_space<vmem>>, vector<8x128xf32>
      tpu.vector_store %arg6[%c0_10, %c0_11], %11 {strides = array<i32>} : memref<8x128xf32, #tpu.memory_space<vmem>>, vector<8x128xf32>,
    } else {
    }
    %c0 = arith.constant 0 : index
    %c0_1 = arith.constant 0 : index
    %3 = vector.load %arg6[%c0, %c0_1] : memref<8x128xf32, #tpu.memory_space<vmem>>, vector<8x128xf32>
    %c0_2 = arith.constant 0 : index
    %c0_3 = arith.constant 0 : index
    %4 = vector.load %arg3[%c0_2, %c0_3] : memref<8x128xf32, #tpu.memory_space<vmem>>, vector<8x128xf32>
    %c0_4 = arith.constant 0 : index
    %c0_5 = arith.constant 0 : index
    %5 = vector.load %arg4[%c0_4, %c0_5] : memref<128x128xf32, #tpu.memory_space<vmem>>, vector<128x128xf32>
    %cst = arith.constant dense<0.000000e+00> : vector<8x128xf32>
    %6 = tpu.matmul %4, %5, %cst {dimension_numbers = #tpu.dot_dimension_numbers<[1], [1], [0], [0], [0, 0, 1, 0], [], []>} : vector<8x128xf32>, vector<128x128xf32>, vector<8x128xf32> -> vector<8x128xf32>
    %7 = arith.addf %3, %6 : vector<8x128xf32>
    %c0_6 = arith.constant 0 : index
    %c0_7 = arith.constant 0 : index
    %8 = vector.load %arg6[%c0_6, %c0_7] : memref<8x128xf32, #tpu.memory_space<vmem>>, vector<8x128xf32>
    tpu.vector_store %arg6[%c0_6, %c0_7], %7 {strides = array<i32>} : memref<8x128xf32, #tpu.memory_space<vmem>>, vector<8x128xf32>,
    return
  }
  func.func @transform_0(%arg0: i32, %arg1: i32, %arg2: i32) -> (i32, i32) {
    %c0_i32 = arith.constant 0 : i32
    return %arg0, %arg2 : i32, i32
  }
  func.func @transform_1(%arg0: i32, %arg1: i32, %arg2: i32) -> (i32, i32) {
    %c0_i32 = arith.constant 0 : i32
    return %arg1, %arg2 : i32, i32
  }
  func.func @transform_2(%arg0: i32, %arg1: i32, %arg2: i32) -> (i32, i32) {
    %c0_i32 = arith.constant 0 : i32
    %c0_i32_0 = arith.constant 0 : i32
    return %c0_i32, %arg1 : i32, i32
  }
  func.func @transform_3(%arg0: i32, %arg1: i32, %arg2: i32) -> (i32, i32) {
    %c0_i32 = arith.constant 0 : i32
    return %arg0, %arg1 : i32, i32
  }
}

</mosaic_0001>

<bundles_post_ra>
// kernel: tpu_custom_call.1
= control target key start
LH: loop header
LB: loop body
LE: loop exit
PB: predicated region body
PF: predicated region fallthrough
CT: control target
= control target key end

     0   :  { %8 = vsyncpa [#allocation3], 0  ;;  %s390_s0 = inlined_call_operand.hbm [shape: f32[8,128], index: 0, kind: input, shape index: {}]   ;;  %s391_s1 = inlined_call_operand.hbm [shape: f32[128,128], index: 1, kind: input, shape index: {}]   ;;  %s392_s2 = inlined_call_operand.vmem [shape: f32[1,128], index: 2, kind: input, shape index: {}]   ;;  %s393_s3 = inlined_call_operand.hbm [shape: f32[8,128], index: 3, kind: output, shape index: {}]  }
   0x1   :  { %9 = vsyncpa [#allocation6], 0 }
   0x2   :  { %10 = vsyncpa [#allocation4], 0  ;;  %s316_s12 = smov [#allocation2]   ;;  %s317_s14 = smov [#allocation5]  }
   0x3   :  { %s17_s13 = sshll.u32 %s316_s12, 4  ;;  %s26_s15 = sshll.u32 %s317_s14, 4  ;;  %s18_s13 = int_to_ptr.vmem [resolvable:$true] %s17_s13  ;;  %s344_s15 = int_to_ptr.vmem [resolvable:$true] %s26_s15 }
   0x4   :  { %s244_s18 = scalar_lea.hbm %s390_s0, 128 }
   0x5   :  { %p245_p0 = scmp.ne.s32.totalorder %s390_s0, %s244_s18  ;;  %p248_p1 = scmp.lt.u32.totalorder %s244_s18, %s390_s0 }
   0x7   :  { %p250_p2 = pnand %p248_p1, %p245_p0 }
   0x9   :  { %253 = shalt.err (!%p250_p2)
}
   0xa   :  { %s254_s23 = scalar_lea.vmem %s18_s13, 128  ;;  %p259_p4 = scmp.lt.s32.totalorder %s18_s13, %s18_s13 }
   0xb   :  { %p255_p3 = scmp.ne.s32.totalorder %s18_s13, %s254_s23  ;;  %p260_p5 = scmp.lt.s32.totalorder %s254_s23, %s254_s23 }
   0xd   :  { %p261_p6 = por %p260_p5, %p259_p4 }
   0xf   :  { %p262_p7 = pnand %p261_p6, %p255_p3 }
  0x11   :  { %265 = shalt.err (!%p262_p7)
}
  0x12   :  { %20 = dma.hbm_to_vmem [thread:$0]  %s390_s0, 128, %s18_s13, [#allocation3]  }
  0x13   :  { %s266_s28 = scalar_lea.hbm %s391_s1, 2048 }
  0x14   :  { %p267_p8 = scmp.ne.s32.totalorder %s391_s1, %s266_s28  ;;  %p270_p9 = scmp.lt.u32.totalorder %s266_s28, %s391_s1 }
  0x16   :  { %p272_p10 = pnand %p270_p9, %p267_p8 }
  0x18   :  { %275 = shalt.err (!%p272_p10)
}
  0x19   :  { %s276_s6 = scalar_lea.vmem %s344_s15, 2048  ;;  %p281_p12 = scmp.lt.s32.totalorder %s344_s15, %s344_s15 }
  0x1a   :  { %p277_p11 = scmp.ne.s32.totalorder %s344_s15, %s276_s6  ;;  %p282_p13 = scmp.lt.s32.totalorder %s276_s6, %s276_s6 }
  0x1c   :  { %p283_p0 = por %p282_p13, %p281_p12 }
  0x1e   :  { %p284_p1 = pnand %p283_p0, %p277_p11 }
  0x20   :  { %287 = shalt.err (!%p284_p1)
}
  0x21   :  { %s318_s0 = smov 128   ;;  %s319_s7 = smov 8  }
  0x22   :  { %32 = dma.hbm_to_vmem [thread:$0]  %s391_s1, 2048, %s344_s15, [#allocation6], %s318_s0, %s318_s0, %s319_s7  }
  0x23   :  { %310 = dma.done.wait [#allocation3], 128  }
  0x24   :  { %311 = vsyncadd [#allocation3], 4294967168 }
  0x25   :  { %312 = dma.done.wait [#allocation6], 2048  }
  0x26   :  { %313 = vsyncadd [#allocation6], 4294965248  ;;  %v320_v0 = vmov 0.0|0.0   ;;  %vm321_vm0 = vmmov 0   ;;  %v322_v1 = vmov 0.0   ;;  %v55_v2 = vld [vmem:[#allocation5] sm:$0xff] }
  0x27   :  { %212 = vmatprep.subr.bf16.mxu0 %v320_v0  ;;  %209 = vmatprep.mubr.msk.f32.mxu0 %vm321_vm0, %v322_v1  ;;  %v56_v3 = vld [vmem:[#allocation5 + $0x8] sm:$0xff]  ;;  %v57_v5 = vld [vmem:[#allocation5 + $0x10] sm:$0xff]  ;;  %v58_v6 = vld [vmem:[#allocation5 + $0x18] sm:$0xff]  ;;  %s323_s11 = smov [#allocation7]  }
  0x28   :  { %v213_v4 = vpack.c.bf16 %v56_v3, %v55_v2  ;;  %v216_v7 = vpack.c.bf16 %v58_v6, %v57_v5  ;;  %v59_v8 = vld [vmem:[#allocation5 + $0x20] sm:$0xff]  ;;  %v60_v9 = vld [vmem:[#allocation5 + $0x28] sm:$0xff]  ;;  %v61_v11 = vld [vmem:[#allocation5 + $0x30] sm:$0xff]  ;;  %s149_s12 = sshll.u32 %s323_s11, 4  ;;  %s150_s12 = int_to_ptr.vmem [resolvable:$true] %s149_s12 }
  0x29   :  { %v219_v10 = vpack.c.bf16 %v60_v9, %v59_v8  ;;  %v62_v12 = vld [vmem:[#allocation5 + $0x38] sm:$0xff]  ;;  %v63_v14 = vld [vmem:[#allocation5 + $0x40] sm:$0xff]  ;;  %v64_v15 = vld [vmem:[#allocation5 + $0x48] sm:$0xff]  ;;  %s288_s13 = scalar_lea.vmem %s150_s12, 128  ;;  %p293_p3 = scmp.lt.s32.totalorder %s150_s12, %s150_s12 }
  0x2a   :  { %214 = vmatpush3.bf16.xpose.msra.mxu0 %v213_v4  ;;  %v222_v13 = vpack.c.bf16 %v62_v12, %v61_v11  ;;  %v225_v16 = vpack.c.bf16 %v64_v15, %v63_v14  ;;  %v65_v17 = vld [vmem:[#allocation5 + $0x50] sm:$0xff]  ;;  %v66_v18 = vld [vmem:[#allocation5 + $0x58] sm:$0xff]  ;;  %v67_v20 = vld [vmem:[#allocation5 + $0x60] sm:$0xff]  ;;  %p289_p2 = scmp.ne.s32.totalorder %s150_s12, %s288_s13  ;;  %p294_p4 = scmp.lt.s32.totalorder %s288_s13, %s288_s13 }
  0x2b   :  { %215 = vmatprep.subr.bf16.mxu0 %v320_v0  ;;  %v228_v19 = vpack.c.bf16 %v66_v18, %v65_v17  ;;  %v68_v21 = vld [vmem:[#allocation5 + $0x68] sm:$0xff]  ;;  %v69_v23 = vld [vmem:[#allocation5 + $0x70] sm:$0xff]  ;;  %v70_v24 = vld [vmem:[#allocation5 + $0x78] sm:$0xff] }
  0x2c   :  { %v231_v22 = vpack.c.bf16 %v68_v21, %v67_v20  ;;  %v234_v25 = vpack.c.bf16 %v70_v24, %v69_v23  ;;  %v54_v26 = vld [vmem:[#allocation2] sm:$0xff]  ;;  %p295_p5 = por %p294_p4, %p293_p3 }
  0x2d   :  { %v159_v27 = vld [vmem:[%s392_s2] ss:$0 sm:$0xff] }
  0x2e   :  { %p296_p6 = pnand %p295_p5, %p289_p2 }
  0x32   :  { %217 = vmatpush3.bf16.xpose.msra.mxu0 %v216_v7 }
  0x33   :  { %218 = vmatprep.subr.bf16.mxu0 %v320_v0 }
  0x3a   :  { %220 = vmatpush3.bf16.xpose.msra.mxu0 %v219_v10 }
  0x3b   :  { %221 = vmatprep.subr.bf16.mxu0 %v320_v0 }
  0x42   :  { %223 = vmatpush3.bf16.xpose.msra.mxu0 %v222_v13 }
  0x43   :  { %224 = vmatprep.subr.bf16.mxu0 %v320_v0 }
  0x4a   :  { %226 = vmatpush3.bf16.xpose.msra.mxu0 %v225_v16 }
  0x4b   :  { %227 = vmatprep.subr.bf16.mxu0 %v320_v0 }
  0x52   :  { %229 = vmatpush3.bf16.xpose.msra.mxu0 %v228_v19 }
  0x53   :  { %230 = vmatprep.subr.bf16.mxu0 %v320_v0 }
  0x5a   :  { %232 = vmatpush3.bf16.xpose.msra.mxu0 %v231_v22 }
  0x5b   :  { %233 = vmatprep.subr.bf16.mxu0 %v320_v0 }
  0x62   :  { %235 = vmatpush3.bf16.xpose.msra.mxu0 %v234_v25 }
  0x69   :  { %210 = vmatmul.mubr.f32.vlgmr.msra.gmra.mrb[0].mxu0 %v54_v26 }
 0x13c   :  { %v137_v28 = vpop.f32.mrb[0].mxu0 }
 0x13d   :  { %v141_v29 = vadd.f32 %v159_v27, %v137_v28  ;;  %v211_v30 = vpop.f32.mrb[1].mxu0 }
 0x13f   :  { %142 = vst [vmem:[#allocation7] sm:$0xff] %v141_v29 }
 0x140   :  { %299 = shalt.err (!%p296_p6)
}
 0x141   :  { %s300_s16 = scalar_lea.hbm %s393_s3, 128 }
 0x142   :  { %p301_p7 = scmp.ne.s32.totalorder %s393_s3, %s300_s16  ;;  %p304_p8 = scmp.lt.u32.totalorder %s300_s16, %s393_s3 }
 0x144   :  { %p306_p9 = pnand %p304_p8, %p301_p7 }
 0x146   :  { %309 = shalt.err (!%p306_p9)
}
 0x147   :  { %152 = dma.vmem_to_hbm [thread:$0]  %s150_s12, 128, %s393_s3, [#allocation4]  }
 0x148   :  { %314 = dma.done.wait [#allocation4], 128  }
 0x149   :  { %315 = vsyncadd [#allocation4], 4294967168 }
 0x14a   :  { %156 = vsyncpa [#allocation3], 1 }
 0x14b   :  { %157 = vsyncpa [#allocation6], 1 }
 0x14c   :  { %158 = vsyncpa [#allocation4], 1 }

</bundles_post_ra>
